<compile_context>
chip_gen: v7x
topology: tpu7x:2x2x1
jax: 0.10.0
libtpu: 0.0.40
codegen_flags: <defaults>
</compile_context>

<pallas_src>
import jax
import jax.numpy as jnp
from jax.experimental import pallas as pl
from jax.experimental.pallas import tpu as pltpu


# ----------------------------- kernels --------------------------------------


def _residual_linear_kernel(x_ref, w_ref, b_ref, o_ref):
    """out = x @ W + b + x with a fully VMEM-resident W."""
    x = x_ref[...]
    # TODO(synk): pass precision=lax.Precision.HIGHEST for bit-accurate f32
    # matmul at larger H (3x MXU cost; irrelevant while HBM-bound).
    y = jnp.dot(x, w_ref[...], preferred_element_type=jnp.float32)
    o_ref[...] = (y + b_ref[...] + x).astype(o_ref.dtype)


def _residual_linear_tiled_kernel(xk_ref, xr_ref, w_ref, b_ref, o_ref, acc_ref):
    """K/N-tiled variant for weights too large to keep VMEM-resident."""
    k = pl.program_id(2)

    @pl.when(k == 0)
    def _():
        acc_ref[...] = jnp.zeros_like(acc_ref)

    acc_ref[...] += jnp.dot(xk_ref[...], w_ref[...],
                            preferred_element_type=jnp.float32)

    @pl.when(k == pl.num_programs(2) - 1)
    def _():
        o_ref[...] = (acc_ref[...] + b_ref[...] + xr_ref[...]).astype(o_ref.dtype)


# ----------------------------- helpers --------------------------------------


def _default_vmem_limit_bytes():
    """Generation-aware VMEM budget (~96 MiB v5e/v6e, ~48 MiB v7x)."""
    try:
        cap = int(pltpu.get_tpu_info().vmem_capacity_bytes)
    except Exception:
        cap = 64 * 1024 * 1024  # conservative: v7x physical VMEM per core
    return (cap * 3) // 4       # leave headroom for compiler scratch


def _round_down8(n):
    return max(8, (n // 8) * 8)


def _largest_lane_divisor(dim, target):
    """Largest multiple of 128 that divides `dim` and is <= target."""
    t = min(dim, max(128, (target // 128) * 128))
    while dim % t:
        t -= 128
    return t


# ----------------------------- wrapper ---------------------------------------


def residual_add_linear(x, w, b, *, tm_target=4096, vmem_limit_bytes=None):
    """ResidualAdd(Linear(H, H)) forward: returns (x @ w + b) + x.

    x: [B, S, H]   w: [H, H]   b: [H]
    """
    B, S, H = x.shape
    M = B * S
    out_dtype = x.dtype
    if vmem_limit_bytes is None:
        vmem_limit_bytes = _default_vmem_limit_bytes()

    # Keep parameters in the activation dtype (native bf16 MXU path, halves
    # the resident-W footprint); accumulation is f32 via preferred_element_type.
    w = w.astype(x.dtype)
    b = b.astype(x.dtype)

    # ---- lane-dense layout: make the last dim a multiple of 128 ------------
    lane_pad = 0
    if H % 128 == 0:
        Hp = H
        xp = x.reshape(M, H)                           # free bitcast
        wp, bp = w, b
    elif 128 % H == 0 and M % (128 // H) == 0:
        # Fold `pack` consecutive rows into one 128-wide row; block-diagonal
        # weight applies W to each packed chunk independently.
        pack = 128 // H
        Hp = H * pack
        xp = x.reshape(M // pack, Hp)                  # free bitcast
        wp = jnp.kron(jnp.eye(pack, dtype=w.dtype), w)
        bp = jnp.tile(b, pack)
    else:
        # Zero-pad the lane dim to the next multiple of 128: full-width loads /
        # MXU passes / stores; padded lanes stay zero through W, b and x.
        Hp = ((H + 127) // 128) * 128
        lane_pad = Hp - H
        xp = jnp.pad(x.reshape(M, H), ((0, 0), (0, lane_pad)))
        wp = jnp.pad(w, ((0, lane_pad), (0, lane_pad)))
        bp = jnp.pad(b, (0, lane_pad))
    bp = bp.reshape(1, Hp)
    Mp = xp.shape[0]

    elt = xp.dtype.itemsize
    headroom = 2 * 1024 * 1024
    # Resident path working set: (conservatively double-buffered) W + b, plus
    # per row: 2x in + 2x out double buffers + the f32 matmul result.
    resident_bytes = 2 * (Hp * Hp + Hp) * wp.dtype.itemsize
    per_row = Hp * (4 * elt + 4)

    if resident_bytes + 8 * per_row + headroom <= vmem_limit_bytes:
        # ------------------- VMEM-resident weight path ----------------------
        max_rows = (vmem_limit_bytes - resident_bytes - headroom) // per_row
        tm = min(int(tm_target), max(int(max_rows), 8))
        if Mp >= 32:
            # >= 4 M-blocks: keeps both v7x TensorCores fed and the DMA
            # pipeline rolling; neutral on v5e/v6e (single TC).
            tm = min(tm, _round_down8(Mp // 4))
        if tm >= Mp:
            tm = Mp                      # single full block (any row count OK)
        else:
            # Sublane-aligned tiles; a ragged trailing tile is masked by
            # Pallas (rows are independent, so this is safe).
            tm = _round_down8(tm)
        grid = (pl.cdiv(Mp, tm),)

        out = pl.pallas_call(
            _residual_linear_kernel,
            out_shape=jax.ShapeDtypeStruct((Mp, Hp), out_dtype),
            grid_spec=pltpu.PrefetchScalarGridSpec(
                num_scalar_prefetch=0,
                grid=grid,
                in_specs=[
                    pl.BlockSpec((tm, Hp), lambda i: (i, 0)),   # x (pipelined)
                    pl.BlockSpec((Hp, Hp), lambda i: (0, 0)),   # W (resident)
                    pl.BlockSpec((1, Hp), lambda i: (0, 0)),    # b (resident)
                ],
                out_specs=pl.BlockSpec((tm, Hp), lambda i: (i, 0)),
            ),
            compiler_params=pltpu.CompilerParams(
                dimension_semantics=("parallel",),
                vmem_limit_bytes=int(vmem_limit_bytes),
            ),
        )(xp, wp, bp)
    else:
        # ------------------- K/N-tiled weight path (large H) ----------------
        tn = tk = _largest_lane_divisor(Hp, 512)
        w_buf = 2 * (tk * tn + tn) * wp.dtype.itemsize
        per_row_t = (2 * tk + 2 * tn) * elt + 2 * tn * elt + tn * 4
        max_rows = (vmem_limit_bytes - w_buf - headroom) // per_row_t
        tm = min(512, max(int(max_rows), 8))
        if tm >= Mp:
            tm = Mp
        else:
            tm = _round_down8(tm)
        grid = (pl.cdiv(Mp, tm), Hp // tn, Hp // tk)

        out = pl.pallas_call(
            _residual_linear_tiled_kernel,
            out_shape=jax.ShapeDtypeStruct((Mp, Hp), out_dtype),
            grid_spec=pltpu.PrefetchScalarGridSpec(
                num_scalar_prefetch=0,
                grid=grid,
                in_specs=[
                    pl.BlockSpec((tm, tk), lambda i, j, k: (i, k)),  # x K-tiles
                    pl.BlockSpec((tm, tn), lambda i, j, k: (i, j)),  # x residual
                    pl.BlockSpec((tk, tn), lambda i, j, k: (k, j)),  # W tile
                    pl.BlockSpec((1, tn), lambda i, j, k: (0, j)),   # b tile
                ],
                out_specs=pl.BlockSpec((tm, tn), lambda i, j, k: (i, j)),
                scratch_shapes=[pltpu.VMEM((tm, tn), jnp.float32)],
            ),
            compiler_params=pltpu.CompilerParams(
                dimension_semantics=("parallel", "parallel", "arbitrary"),
                vmem_limit_bytes=int(vmem_limit_bytes),
            ),
        )(xp, xp, wp, bp)

    if lane_pad:
        out = out[:, :H]
    return out.reshape(B, S, H)


if __name__ == "__main__":
    key = jax.random.PRNGKey(0)
    k_x, k_w, k_b = jax.random.split(key, 3)

    B, S, H = 2, 8, 32
    x = jax.random.normal(k_x, (B, S, H), dtype=jnp.float32)
    # Deterministic "Linear(H, H)" parameters (synthetic, not a checkpoint).
    w = jax.random.normal(k_w, (H, H), dtype=jnp.float32) * 0.05
    b = jax.random.normal(k_b, (H,), dtype=jnp.float32) * 0.05

    fwd = jax.jit(residual_add_linear)
    out = jax.block_until_ready(fwd(x, w, b))

    # Pure-JAX reference: ResidualAdd semantics -> fn(x) + x
    ref = (x @ w + b) + x
    assert out.shape == x.shape and out.dtype == x.dtype
    assert jnp.allclose(out, ref, atol=1e-5, rtol=1e-5), "mismatch vs reference"

    print("KERNEL_OK")
</pallas_src>

<mosaic_0001>
module attributes {stable_mosaic.version = 11 : i64} {
  func.func @_residual_linear_kernel(%arg0: i32, %arg1: memref<4x128xf32, #tpu.memory_space<vmem>>, %arg2: memref<128x128xf32, #tpu.memory_space<vmem>>, %arg3: memref<1x128xf32, #tpu.memory_space<vmem>>, %arg4: memref<4x128xf32, #tpu.memory_space<vmem>>) attributes {dimension_semantics = [#tpu.dimension_semantics<parallel>], iteration_bounds = array<i64: 1>, scalar_prefetch = 0 : i64, scratch_operands = 0 : i64, tpu.core_type = #tpu.core_type<tc>, window_params = [{transform_indices = @transform_0, window_bounds = array<i64: 4, 128>}, {pipeline_mode = #tpu.pipeline_mode<synchronous>, transform_indices = @transform_1, window_bounds = array<i64: 128, 128>}, {pipeline_mode = #tpu.pipeline_mode<synchronous>, transform_indices = @transform_2, window_bounds = array<i64: 1, 128>}, {transform_indices = @transform_3, window_bounds = array<i64: 4, 128>}]} {
    %c0 = arith.constant 0 : index
    %c0_0 = arith.constant 0 : index
    %0 = vector.load %arg1[%c0, %c0_0] : memref<4x128xf32, #tpu.memory_space<vmem>>, vector<4x128xf32>
    %c0_1 = arith.constant 0 : index
    %c0_2 = arith.constant 0 : index
    %1 = vector.load %arg2[%c0_1, %c0_2] : memref<128x128xf32, #tpu.memory_space<vmem>>, vector<128x128xf32>
    %cst = arith.constant dense<0.000000e+00> : vector<4x128xf32>
    %2 = tpu.matmul %0, %1, %cst {dimension_numbers = #tpu.dot_dimension_numbers<[1], [0], [0], [1], [0, 0, 1, 1], [], []>} : vector<4x128xf32>, vector<128x128xf32>, vector<4x128xf32> -> vector<4x128xf32>
    %c0_3 = arith.constant 0 : index
    %c0_4 = arith.constant 0 : index
    %3 = vector.load %arg3[%c0_3, %c0_4] : memref<1x128xf32, #tpu.memory_space<vmem>>, vector<1x128xf32>
    %4 = vector.broadcast %3 : vector<1x128xf32> to vector<4x128xf32>
    %5 = arith.addf %2, %4 : vector<4x128xf32>
    %6 = arith.addf %5, %0 : vector<4x128xf32>
    %c0_5 = arith.constant 0 : index
    %c0_6 = arith.constant 0 : index
    %7 = vector.load %arg4[%c0_5, %c0_6] : memref<4x128xf32, #tpu.memory_space<vmem>>, vector<4x128xf32>
    tpu.vector_store %arg4[%c0_5, %c0_6], %6 {strides = array<i32>} : memref<4x128xf32, #tpu.memory_space<vmem>>, vector<4x128xf32>,
    return
  }
  func.func @transform_0(%arg0: i32) -> (i32, i32) {
    %c0_i32 = arith.constant 0 : i32
    %c0_i32_0 = arith.constant 0 : i32
    return %arg0, %c0_i32 : i32, i32
  }
  func.func @transform_1(%arg0: i32) -> (i32, i32) {
    %c0_i32 = arith.constant 0 : i32
    %c0_i32_0 = arith.constant 0 : i32
    %c0_i32_1 = arith.constant 0 : i32
    return %c0_i32, %c0_i32_0 : i32, i32
  }
  func.func @transform_2(%arg0: i32) -> (i32, i32) {
    %c0_i32 = arith.constant 0 : i32
    %c0_i32_0 = arith.constant 0 : i32
    %c0_i32_1 = arith.constant 0 : i32
    return %c0_i32, %c0_i32_0 : i32, i32
  }
  func.func @transform_3(%arg0: i32) -> (i32, i32) {
    %c0_i32 = arith.constant 0 : i32
    %c0_i32_0 = arith.constant 0 : i32
    return %arg0, %c0_i32 : i32, i32
  }
}

</mosaic_0001>

<bundles_post_ra>
// kernel: tile.8
= control target key start
LH: loop header
LB: loop body
LE: loop exit
PB: predicated region body
PF: predicated region fallthrough
CT: control target
= control target key end

     0   :  { %s22_s0 = inlined_call_operand.vmem [shape: f32[32], index: 0, kind: input, shape index: {}]   ;;  %s23_s1 = inlined_call_operand.vmem [shape: f32[4,32], index: 1, kind: output, shape index: {}]  }
   0x1   :  { %v4_v0 = vld [vmem:[%s22_s0] ss:$0 sm:$0xff] }
   0x2   :  { %5 = vst [vmem:[%s23_s1] sm:$0xf] %v4_v0 }

// kernel: tile.9
= control target key start
LH: loop header
LB: loop body
LE: loop exit
PB: predicated region body
PF: predicated region fallthrough
CT: control target
= control target key end

     0   :  { %vm7_vm0 = vcmask 261120   ;;  %s37_s8 = smov 32   ;;  %s38_s9 = smov 64   ;;  %vm13_vm1 = vcmask 1048320   ;;  %vm19_vm2 = vcmask 785920   ;;  %vm25_vm3 = vcmask 523520   ;;  %s55_s0 = inlined_call_operand.vmem [shape: f32[4,32], index: 0, kind: input, shape index: {}]   ;;  %s56_s1 = inlined_call_operand.vmem [shape: f32[1,128], index: 1, kind: output, shape index: {}]  }
   0x1   :  { %v4_v0 = vld [vmem:[%s55_s0] sm:$0xf]  ;;  %s36_s0 = smov 96  }
   0x2   :  { %5 = vst [vmem:[#allocation1] sm:$0xf] %v4_v0 }
   0x9   :  { %v10_v1 = vld [vmem:[#allocation1 + $0x3] sm:$0x1]   ;;  %v22_v2 = vld [vmem:[#allocation1 + $0x1] sm:$0x1]   ;;  %v6_v3 = vld [vmem:[#allocation1] sm:$0x1]  }
   0xa   :  { %11 = vrot.lane.b32.xlu0 %v10_v1, %s36_s0  ;;  %23 = vrot.lane.b32.xlu1 %v22_v2, %s37_s8  ;;  %v16_v4 = vld [vmem:[#allocation1 + $0x2] sm:$0x1]   ;;  %8 = vst.msk [vmem:[#allocation0] sm:$0x1] %vm7_vm0, %v6_v3  }
   0xe   :  { %17 = vrot.lane.b32.xlu0 %v16_v4, %s38_s9 }
  0x7c   :  { %v12_v5 = vpop.permute.xlu0 %11   ;;  %v24_v6 = vpop.permute.xlu1 %23  }
  0x7d   :  { %14 = vst.msk [vmem:[#allocation0] sm:$0x1] %vm13_vm1, %v12_v5  }
  0x80   :  { %v18_v7 = vpop.permute.xlu0 %17  }
  0x81   :  { %20 = vst.msk [vmem:[#allocation0] sm:$0x1] %vm19_vm2, %v18_v7  }
  0x82   :  { %26 = vst.msk [vmem:[#allocation0] sm:$0x1] %vm25_vm3, %v24_v6  }
  0x89   :  { %v30_v8 = vld [vmem:[#allocation0] sm:$0x1] }
  0x8a   :  { %32 = vst [vmem:[%s56_s1] sm:$0x1] %v30_v8 }

// kernel: residual_add_linear.1
= control target key start
LH: loop header
LB: loop body
LE: loop exit
PB: predicated region body
PF: predicated region fallthrough
CT: control target
= control target key end

     0   :  { %v194_v0 = vmov 0.0|0.0   ;;  %vm195_vm0 = vmmov 0   ;;  %v196_v4 = vmov 0.0   ;;  %s274_s1 = inlined_call_operand.vmem [shape: f32[128,128], index: 1, kind: input, shape index: {}]   ;;  %s275_s0 = inlined_call_operand.vmem [shape: f32[4,128], index: 0, kind: input, shape index: {}]   ;;  %s276_s2 = inlined_call_operand.vmem [shape: f32[1,128], index: 2, kind: input, shape index: {}]   ;;  %s277_s3 = inlined_call_operand.vmem [shape: f32[4,128], index: 3, kind: output, shape index: {}]  }
   0x1   :  { %167 = vmatprep.subr.bf16.mxu0 %v194_v0  ;;  %v15_v1 = vld [vmem:[%s274_s1] sm:$0xff]  ;;  %v16_v2 = vld [vmem:[%s274_s1 + $0x8] sm:$0xff]  ;;  %v17_v3 = vld [vmem:[%s274_s1 + $0x10] sm:$0xff]  ;;  %164 = vmatprep.mubr.msk.f32.mxu0 %vm195_vm0, %v196_v4 }
   0x2   :  { %v168_v5 = vpack.c.bf16 %v16_v2, %v15_v1  ;;  %v18_v6 = vld [vmem:[%s274_s1 + $0x18] sm:$0xff]  ;;  %v19_v8 = vld [vmem:[%s274_s1 + $0x20] sm:$0xff]  ;;  %v20_v9 = vld [vmem:[%s274_s1 + $0x28] sm:$0xff] }
   0x3   :  { %v171_v7 = vpack.c.bf16 %v18_v6, %v17_v3  ;;  %v174_v10 = vpack.c.bf16 %v20_v9, %v19_v8  ;;  %v21_v11 = vld [vmem:[%s274_s1 + $0x30] sm:$0xff]  ;;  %v22_v12 = vld [vmem:[%s274_s1 + $0x38] sm:$0xff]  ;;  %v23_v14 = vld [vmem:[%s274_s1 + $0x40] sm:$0xff] }
   0x4   :  { %169 = vmatpush3.bf16.msra.mxu0 %v168_v5  ;;  %v177_v13 = vpack.c.bf16 %v22_v12, %v21_v11  ;;  %v24_v15 = vld [vmem:[%s274_s1 + $0x48] sm:$0xff]  ;;  %v25_v17 = vld [vmem:[%s274_s1 + $0x50] sm:$0xff]  ;;  %v26_v18 = vld [vmem:[%s274_s1 + $0x58] sm:$0xff] }
   0x5   :  { %170 = vmatprep.subr.bf16.mxu0 %v194_v0  ;;  %v180_v16 = vpack.c.bf16 %v24_v15, %v23_v14  ;;  %v183_v19 = vpack.c.bf16 %v26_v18, %v25_v17  ;;  %v27_v20 = vld [vmem:[%s274_s1 + $0x60] sm:$0xff]  ;;  %v28_v21 = vld [vmem:[%s274_s1 + $0x68] sm:$0xff]  ;;  %v29_v23 = vld [vmem:[%s274_s1 + $0x70] sm:$0xff] }
   0x6   :  { %v186_v22 = vpack.c.bf16 %v28_v21, %v27_v20  ;;  %v30_v24 = vld [vmem:[%s274_s1 + $0x78] sm:$0xff]  ;;  %v14_v26 = vld [vmem:[%s275_s0] sm:$0xf] }
   0x7   :  { %v189_v25 = vpack.c.bf16 %v30_v24, %v29_v23  ;;  %v114_v27 = vld [vmem:[%s276_s2] ss:$0 sm:$0xff] }
   0x8   :  { %172 = vmatpush3.bf16.msra.mxu0 %v171_v7 }
   0x9   :  { %173 = vmatprep.subr.bf16.mxu0 %v194_v0 }
   0xc   :  { %175 = vmatpush3.bf16.msra.mxu0 %v174_v10 }
   0xd   :  { %176 = vmatprep.subr.bf16.mxu0 %v194_v0 }
  0x10   :  { %178 = vmatpush3.bf16.msra.mxu0 %v177_v13 }
  0x11   :  { %179 = vmatprep.subr.bf16.mxu0 %v194_v0 }
  0x14   :  { %181 = vmatpush3.bf16.msra.mxu0 %v180_v16 }
  0x15   :  { %182 = vmatprep.subr.bf16.mxu0 %v194_v0 }
  0x18   :  { %184 = vmatpush3.bf16.msra.mxu0 %v183_v19 }
  0x19   :  { %185 = vmatprep.subr.bf16.mxu0 %v194_v0 }
  0x1c   :  { %187 = vmatpush3.bf16.msra.mxu0 %v186_v22 }
  0x1d   :  { %188 = vmatprep.subr.bf16.mxu0 %v194_v0 }
  0x20   :  { %190 = vmatpush3.bf16.msra.mxu0 %v189_v25 }
  0x23   :  { %165 = vmatmul.mubr.f32.vlgmr.msra.gmra.mrb[0].mxu0 %v14_v26 }
  0xf6   :  { %v104_v28 = vpop.f32.mrb[0].mxu0 }
  0xf7   :  { %v105_v29 = vadd.f32 %v114_v27, %v104_v28  ;;  %v166_v30 = vpop.f32.mrb[1].mxu0 }
  0xf9   :  { %v108_v31 = vadd.f32 %v105_v29, %v14_v26 }
  0xfb   :  { %109 = vst [vmem:[%s277_s3] sm:$0xf] %v108_v31 }

</bundles_post_ra>
